<compile_context>
chip_gen: v5e
topology: v5e:2x2
jax: 0.10.0
libtpu: 0.0.40
codegen_flags: <defaults>
</compile_context>

<pallas_src>
import jax
import jax.numpy as jnp
from jax.experimental import pallas as pl
from jax.experimental.pallas import tpu as pltpu


_LANES = 512                          # lane-dense width (multiple of 128)
_TARGET_BLOCK_BYTES = 2 * 1024 * 1024  # ~2 MiB per buffer per grid step
_MIN_TILES = 4                         # aim for >= 4 grid steps on larger inputs


def _h_sigmoid_kernel(x_ref, o_ref):
    x = x_ref[...]
    # relu6(x + 3) / 6  (divide, matching PyTorch exactly)
    o_ref[...] = (jnp.clip(x + 3.0, 0.0, 6.0) / 6.0).astype(o_ref.dtype)


def _round_up(n, m):
    return ((n + m - 1) // m) * m


def h_sigmoid(x):
    """x: any-shape array. Returns relu6(x + 3) / 6 with same shape/dtype."""
    orig_shape = x.shape
    total = x.size
    if total == 0:
        return x

    flat = x.reshape(-1)

    # Only the sub-512-element tail is ever padded (rare); if total is already
    # a multiple of 512 there is no pad and no trailing slice at all.
    rem = total % _LANES
    padded_total = total if rem == 0 else total + (_LANES - rem)
    if padded_total != total:
        flat = jnp.pad(flat, (0, padded_total - total))
    rows = padded_total // _LANES
    x2d = flat.reshape(rows, _LANES)

    # Sublane granularity per dtype (f32: 8, bf16: 16, int8/fp8: 32).
    itemsize = jnp.dtype(x.dtype).itemsize
    sub = max(8, 32 // max(1, itemsize))

    if rows <= sub:
        # Tiny input: one full-extent block (block dim == array dim is legal).
        block_rows = rows
    else:
        # Cap one buffer at ~2 MiB (dtype-scaled rows), but force at least
        # _MIN_TILES grid steps so DMA/compute overlap and v7x can shard row
        # tiles across its two TensorCores. Ragged last tile is fine.
        cap_rows = max(sub, (_TARGET_BLOCK_BYTES // (_LANES * itemsize)) // sub * sub)
        want_rows = _round_up(pl.cdiv(rows, _MIN_TILES), sub)
        block_rows = max(sub, min(cap_rows, want_rows))
    num_tiles = pl.cdiv(rows, block_rows)

    out2d = pl.pallas_call(
        _h_sigmoid_kernel,
        out_shape=jax.ShapeDtypeStruct((rows, _LANES), x.dtype),
        grid_spec=pltpu.PrefetchScalarGridSpec(
            num_scalar_prefetch=0,
            grid=(num_tiles,),
            # block_rows is a multiple of the sublane granularity (or equals
            # the full row extent) and 512 is a multiple of 128, so the
            # (8,128) block-shape constraint is satisfied; the ragged last
            # tile (if any) is masked by Pallas.
            in_specs=[pl.BlockSpec((block_rows, _LANES), lambda i: (i, 0))],
            out_specs=pl.BlockSpec((block_rows, _LANES), lambda i: (i, 0)),
        ),
        compiler_params=pltpu.CompilerParams(
            # parallel: lets v7x shard row tiles across its two TensorCores;
            # harmless on single-TC v5e/v6e.
            dimension_semantics=("parallel",),
        ),
    )(x2d)

    out_flat = out2d.reshape(-1)
    if padded_total != total:
        out_flat = out_flat[:total]
    return out_flat.reshape(orig_shape)


if __name__ == "__main__":
    key = jax.random.PRNGKey(0)

    def _ref(a):
        return jnp.clip(a + 3.0, 0.0, 6.0) / 6.0

    # Primary check: module-consistent NCHW shape, total divisible by 512
    # (zero-copy path, single tile).
    x = jax.random.normal(key, (2, 4, 16, 16), dtype=jnp.float32) * 4.0
    out = jax.block_until_ready(h_sigmoid(x))
    assert out.shape == x.shape and out.dtype == x.dtype
    assert jnp.max(jnp.abs(out - _ref(x))) < 1e-6

    # Multi-tile path (rows > sublane granularity -> >= 4 grid steps).
    k1, k2 = jax.random.split(key)
    x2 = jax.random.normal(k1, (2, 32, 32, 32), dtype=jnp.float32) * 4.0
    out2 = jax.block_until_ready(h_sigmoid(x2))
    assert jnp.max(jnp.abs(out2 - _ref(x2))) < 1e-6

    # Non-divisible total (exercises the small tail pad + ragged handling).
    x3 = jax.random.normal(k2, (2, 3, 7, 5), dtype=jnp.float32) * 4.0
    out3 = jax.block_until_ready(h_sigmoid(x3))
    assert out3.shape == x3.shape
    assert jnp.max(jnp.abs(out3 - _ref(x3))) < 1e-6

    print("KERNEL_OK")
</pallas_src>

<mosaic_0001>
module attributes {stable_mosaic.version = 11 : i64} {
  func.func @_h_sigmoid_kernel(%arg0: i32, %arg1: memref<4x512xf32, #tpu.memory_space<vmem>>, %arg2: memref<4x512xf32, #tpu.memory_space<vmem>>) attributes {dimension_semantics = [#tpu.dimension_semantics<parallel>], iteration_bounds = array<i64: 1>, scalar_prefetch = 0 : i64, scratch_operands = 0 : i64, tpu.core_type = #tpu.core_type<tc>, window_params = [{transform_indices = @transform_0, window_bounds = array<i64: 4, 512>}, {transform_indices = @transform_1, window_bounds = array<i64: 4, 512>}]} {
    %c0 = arith.constant 0 : index
    %c0_0 = arith.constant 0 : index
    %0 = vector.load %arg1[%c0, %c0_0] : memref<4x512xf32, #tpu.memory_space<vmem>>, vector<4x512xf32>
    %cst = arith.constant 3.000000e+00 : f32
    %1 = vector.broadcast %cst : f32 to vector<4x512xf32>
    %2 = arith.addf %0, %1 : vector<4x512xf32>
    %cst_1 = arith.constant 0.000000e+00 : f32
    %cst_2 = arith.constant 6.000000e+00 : f32
    %3 = vector.broadcast %cst_1 : f32 to vector<4x512xf32>
    %4 = arith.maximumf %3, %2 : vector<4x512xf32>
    %5 = vector.broadcast %cst_2 : f32 to vector<4x512xf32>
    %6 = arith.minimumf %5, %4 : vector<4x512xf32>
    %cst_3 = arith.constant 6.000000e+00 : f32
    %7 = vector.broadcast %cst_3 : f32 to vector<4x512xf32>
    %8 = arith.divf %6, %7 : vector<4x512xf32>
    %c0_4 = arith.constant 0 : index
    %c0_5 = arith.constant 0 : index
    %9 = vector.load %arg2[%c0_4, %c0_5] : memref<4x512xf32, #tpu.memory_space<vmem>>, vector<4x512xf32>
    tpu.vector_store %arg2[%c0_4, %c0_5], %8 {strides = array<i32>} : memref<4x512xf32, #tpu.memory_space<vmem>>, vector<4x512xf32>,
    return
  }
  func.func @transform_0(%arg0: i32) -> (i32, i32) {
    %c0_i32 = arith.constant 0 : i32
    %c0_i32_0 = arith.constant 0 : i32
    return %arg0, %c0_i32 : i32, i32
  }
  func.func @transform_1(%arg0: i32) -> (i32, i32) {
    %c0_i32 = arith.constant 0 : i32
    %c0_i32_0 = arith.constant 0 : i32
    return %arg0, %c0_i32 : i32, i32
  }
}

</mosaic_0001>

<bundles_post_ra>
// kernel: tpu_custom_call.1
= control target key start
LH: loop header
LB: loop body
LE: loop exit
PB: predicated region body
PF: predicated region fallthrough
CT: control target
= control target key end

     0   :  { %6 = vsyncpa [#allocation3], 0  ;;  %s135_s0 = inlined_call_operand.hbm [shape: f32[4,512], index: 0, kind: input, shape index: {}]   ;;  %s136_s1 = inlined_call_operand.hbm [shape: f32[4,512], index: 1, kind: output, shape index: {}]  }
   0x1   :  { %7 = vsyncpa [#allocation4], 0  ;;  %s13_s8 = sshll.u32 %s135_s0, 4  ;;  %s116_s9 = smov [#allocation2]   ;;  %s14_s8 = int_to_ptr.hbm [resolvable:$true] %s13_s8 }
   0x2   :  { %s15_s10 = sshll.u32 %s116_s9, 4  ;;  %s16_s10 = int_to_ptr.vmem [resolvable:$true] %s15_s10 }
   0x3   :  { %18 = dma.hbm_to_vmem [thread:$0]  %s14_s8, 256, %s16_s10, [#allocation3]  }
   0x4   :  { %112 = dma.done.wait [#allocation3], 256  }
   0x5   :  { %113 = vsyncadd [#allocation3], 4294967040  ;;  %v117_v0 = vmov 6.0   ;;  %v23_v2 = vld [vmem:[#allocation2] sm:$0xff]  ;;  %v24_v3 = vld [vmem:[#allocation2 + $0x8] sm:$0xff]  ;;  %s118_s0 = smov [#allocation5]  }
   0x6   :  { %62 = vrcp.f32 %v117_v0  ;;  %v25_v4 = vadd.f32 3.0, %v23_v2  ;;  %v26_v6 = vadd.f32 3.0, %v24_v3  ;;  %s47_s11 = sshll.u32 %s118_s0, 4  ;;  %s49_s14 = sshll.u32 %s136_s1, 4  ;;  %s48_s11 = int_to_ptr.vmem [resolvable:$true] %s47_s11  ;;  %s50_s14 = int_to_ptr.hbm [resolvable:$true] %s49_s14 }
   0x8   :  { %v27_v7 = vmax.f32 %v25_v4, 0.0  ;;  %v28_v9 = vmax.f32 %v26_v6, 0.0 }
   0xa   :  { %v29_v11 = vmin.f32 %v27_v7, 6.0  ;;  %v30_v12 = vmin.f32 %v28_v9, 6.0 }
   0xc   :  { %v63_v1 = vpop.eup %62 }
   0xd   :  { %v32_v5 = vmul.f32 6.0, %v63_v1  ;;  %vm36_vm0 = vweird.f32 %v63_v1 }
   0xf   :  { %v33_v8 = vsub.f32 1.0, %v32_v5 }
  0x11   :  { %v34_v10 = vmul.f32 %v63_v1, %v33_v8 }
  0x13   :  { %v35_v13 = vadd.f32 %v63_v1, %v34_v10 }
  0x15   :  { %v37_v14 = vsel %vm36_vm0, %v63_v1, %v35_v13 }
  0x16   :  { %v38_v15 = vmul.f32 %v37_v14, %v29_v11  ;;  %v39_v16 = vmul.f32 %v37_v14, %v30_v12 }
  0x18   :  { %40 = vst [vmem:[#allocation5] sm:$0xff] %v38_v15 }
  0x19   :  { %41 = vst [vmem:[#allocation5 + $0x8] sm:$0xff] %v39_v16 }
  0x1a   :  { %52 = dma.vmem_to_hbm [thread:$0]  %s48_s11, 256, %s50_s14, [#allocation4]  }
  0x1b   :  { %114 = dma.done.wait [#allocation4], 256  }
  0x1c   :  { %115 = vsyncadd [#allocation4], 4294967040 }
  0x1d   :  { %57 = vsyncpa [#allocation3], 1 }
  0x1e   :  { %58 = vsyncpa [#allocation4], 1 }

</bundles_post_ra>
